<compile_context>
chip_gen: v6e
topology: v6e:2x2x1
jax: 0.10.0
libtpu: 0.0.40
codegen_flags: <defaults>
</compile_context>

<pallas_src>
import functools

import jax
import jax.numpy as jnp
from jax import lax
from jax.experimental import pallas as pl
from jax.experimental.pallas import tpu as pltpu


def transformer_layer_kernel(x_ref, mask_ref, wq_ref, wk_ref, wv_ref, wo_ref,
                             w1_ref, w2_ref, bias_ref, out_ref, *, num_heads):
    l = pl.program_id(1)
    rows, D = x_ref.shape                  # rows == Bt * S
    S = mask_ref.shape[0]
    Bt = rows // S
    H = num_heads
    HK = wq_ref.shape[2]
    K = HK // H
    F = w1_ref.shape[2]
    f32 = jnp.float32
    bf16 = jnp.bfloat16

    # New batch block -> load embedded tokens into the resident output block,
    # which doubles as the residual carry across the layer axis.
    @pl.when(l == 0)
    def _():
        out_ref[...] = x_ref[...]

    x = out_ref[...]                       # (Bt*S, D) f32 residual stream
    xb = x.astype(bf16)

    # Per-layer biases, packed as rows of one (6, maxW) block (lane offset 0).
    bias = bias_ref[0]
    bq = bias[0:1, :HK]                    # already pre-scaled by 1/sqrt(K)
    bk = bias[1:2, :HK]
    bv = bias[2:3, :HK]
    bo = bias[3:4, :D]
    b1 = bias[4:5, :F]
    b2 = bias[5:6, :D]

    # --- QKV projections: full (Bt*S, D) x (D, HK) MXU matmuls, bf16 in /
    #     f32 accumulate.  1/sqrt(K) was folded into wq/bq in the wrapper. ---
    q = jnp.dot(xb, wq_ref[0], preferred_element_type=f32) + bq    # (Bt*S, HK)
    k = jnp.dot(xb, wk_ref[0], preferred_element_type=f32) + bk
    v = jnp.dot(xb, wv_ref[0], preferred_element_type=f32) + bv

    # Head split: lane slices stacked along a new major axis, then a
    # layout-preserving reshape (S is a multiple of the 8-row sublane tile)
    # to put (head, batch) jointly on the batch axis of the attention dots.
    def split_heads(t):                    # (Bt*S, HK) -> (H*Bt, S, K)
        th = jnp.stack([t[:, h * K:(h + 1) * K] for h in range(H)], axis=0)
        return th.reshape(H * Bt, S, K)

    qh = split_heads(q).astype(bf16)
    kh = split_heads(k).astype(bf16)
    vh = split_heads(v).astype(bf16)

    # --- causal attention, batched over (head, batch): no per-head loop ---
    s = lax.dot_general(qh, kh, (((2,), (2,)), ((0,), (0,))),
                        preferred_element_type=f32)                # (H*Bt, S, S)
    s = s + mask_ref[...][None]            # additive causal mask (0 / -1e30)

    m = jnp.max(s, axis=-1, keepdims=True)
    p = jnp.exp(s - m)
    denom = jnp.sum(p, axis=-1, keepdims=True)
    p = p * pl.reciprocal(denom, approx=True)                      # EUP recip

    o = lax.dot_general(p.astype(bf16), vh, (((2,), (1,)), ((0,), (0,))),
                        preferred_element_type=f32)                # (H*Bt, S, K)

    # Fuse heads back onto the lane dim and run ONE o-projection matmul that
    # contracts the full H*K depth (instead of H small-K batched matmuls).
    o3 = o.reshape(H, Bt * S, K)                                   # free reshape
    oc = jnp.concatenate([o3[h] for h in range(H)], axis=-1)       # (Bt*S, HK)
    attn_out = jnp.dot(oc.astype(bf16), wo_ref[0],
                       preferred_element_type=f32) + bo            # (Bt*S, D)
    x = x + attn_out

    # --- feed forward: Linear -> ReLU -> Linear, bf16 matmuls / f32 math ---
    h1 = jnp.dot(x.astype(bf16), w1_ref[0], preferred_element_type=f32) + b1
    h1 = jnp.maximum(h1, 0.0)
    x = x + jnp.dot(h1.astype(bf16), w2_ref[0], preferred_element_type=f32) + b2

    out_ref[...] = x


def classifier_kernel(x_ref, w_ref, b_ref, out_ref):
    out_ref[...] = (jnp.dot(x_ref[...].astype(jnp.bfloat16), w_ref[...],
                            preferred_element_type=jnp.float32) + b_ref[...])


def _vmem_limit_bytes():
    try:
        cap = pltpu.get_tpu_info().vmem_capacity_bytes
    except Exception:
        cap = 64 * 1024 * 1024             # conservative fallback (v7x-sized)
    return int(cap * 0.85)


def transformer_forward(tokens, params, *, num_layers, num_heads, key_size,
                        batch_block=None):
    """tokens: int32 [B, S] -> logits float32 [B, S, num_classes]."""
    B, S = tokens.shape
    D = params['tok_emb'].shape[1]
    HK = num_heads * key_size
    F = params['w1'].shape[2]
    C = params['fc_w'].shape[1]
    Cpad = ((C + 127) // 128) * 128        # lane-dense classifier output

    # Batch block: weights are streamed once per batch block, so the bigger
    # the block the less HBM weight traffic (cap by VMEM at realistic sizes).
    if batch_block is None:
        batch_block = B
    assert B % batch_block == 0
    Bt = batch_block
    nb = B // Bt
    rows = Bt * S

    # Embedding + positional encoding (gather glue in plain JAX), flattened to
    # (B*S, D) so kernel matmuls see an M dim of Bt*S.
    x = params['tok_emb'][tokens] + params['pos_emb'][jnp.arange(S)][None, :, :]
    x = x.astype(jnp.float32).reshape(B * S, D)

    bf16 = jnp.bfloat16
    scale = 1.0 / (float(key_size) ** 0.5)
    wq = (params['wq'] * scale).astype(bf16)   # fold 1/sqrt(K) into q path
    wk = params['wk'].astype(bf16)
    wv = params['wv'].astype(bf16)
    wo = params['wo'].astype(bf16)             # kept as (L, HK, D): fused o-proj
    w1 = params['w1'].astype(bf16)
    w2 = params['w2'].astype(bf16)

    # Pack the six per-layer biases into one (L, 6, maxW) tensor (one DMA per
    # layer step; every slice in-kernel starts at lane 0).
    maxW = max(HK, D, F)

    def padw(b):
        return jnp.pad(b, ((0, 0), (0, 0), (0, maxW - b.shape[-1])))

    bias = jnp.concatenate(
        [padw(params['bq'] * scale), padw(params['bk']), padw(params['bv']),
         padw(params['bo']), padw(params['b1']), padw(params['b2'])],
        axis=1).astype(jnp.float32)            # (L, 6, maxW)

    # Additive causal mask, built once (hoisted out of the per-step body).
    row = jnp.arange(S)[:, None]
    col = jnp.arange(S)[None, :]
    mask = jnp.where(col > row, jnp.float32(-1e30), jnp.float32(0.0))

    vmem_limit = _vmem_limit_bytes()

    kernel = functools.partial(transformer_layer_kernel, num_heads=num_heads)

    def layer_spec(*shape):                    # streamed one layer per step
        return pl.BlockSpec((1,) + shape, lambda b, l: (l,) + (0,) * len(shape))

    resid = pl.pallas_call(
        kernel,
        out_shape=jax.ShapeDtypeStruct((B * S, D), jnp.float32),
        grid=(nb, num_layers),
        in_specs=[
            pl.BlockSpec((rows, D), lambda b, l: (b, 0)),   # embedded x
            pl.BlockSpec((S, S), lambda b, l: (0, 0)),      # causal mask
            layer_spec(D, HK),                               # wq (pre-scaled)
            layer_spec(D, HK),                               # wk
            layer_spec(D, HK),                               # wv
            layer_spec(HK, D),                               # wo
            layer_spec(D, F),                                # w1
            layer_spec(F, D),                                # w2
            layer_spec(6, maxW),                             # packed biases
        ],
        out_specs=pl.BlockSpec((rows, D), lambda b, l: (b, 0)),  # residual carry
        compiler_params=pltpu.CompilerParams(
            dimension_semantics=("parallel", "arbitrary"),
            vmem_limit_bytes=vmem_limit),
    )(x, mask, wq, wk, wv, wo, w1, w2, bias)

    # --- final classifier in its own pallas_call (lane-dense, vocab-tiled) ---
    fc_w = jnp.zeros((D, Cpad), bf16).at[:, :C].set(params['fc_w'].astype(bf16))
    fc_b = jnp.zeros((1, Cpad), jnp.float32).at[:, :C].set(params['fc_b'])

    Ct = Cpad
    for cand in (2048, 1024, 512, 256, 128):
        if Cpad > cand and Cpad % cand == 0:
            Ct = cand
            break
    ncb = Cpad // Ct

    logits = pl.pallas_call(
        classifier_kernel,
        out_shape=jax.ShapeDtypeStruct((B * S, Cpad), jnp.float32),
        grid=(nb, ncb),
        in_specs=[
            pl.BlockSpec((rows, D), lambda i, j: (i, 0)),
            pl.BlockSpec((D, Ct), lambda i, j: (0, j)),
            pl.BlockSpec((1, Ct), lambda i, j: (0, j)),
        ],
        out_specs=pl.BlockSpec((rows, Ct), lambda i, j: (i, j)),
        compiler_params=pltpu.CompilerParams(
            dimension_semantics=("parallel", "parallel"),
            vmem_limit_bytes=vmem_limit),
    )(resid, fc_w, fc_b)

    return logits[:, :C].reshape(B, S, C)


def reference_forward(tokens, params, *, num_layers, num_heads, key_size):
    """Pure-JAX float32 reference mirroring the PyTorch forward semantics."""
    B, S = tokens.shape
    x = params['tok_emb'][tokens] + params['pos_emb'][jnp.arange(S)][None, :, :]
    mask = jnp.triu(jnp.ones((S, S), dtype=bool), k=1)
    for l in range(num_layers):
        q = x @ params['wq'][l] + params['bq'][l]
        k = x @ params['wk'][l] + params['bk'][l]
        v = x @ params['wv'][l] + params['bv'][l]
        q = q.reshape(B, S, num_heads, key_size).transpose(0, 2, 1, 3)
        k = k.reshape(B, S, num_heads, key_size).transpose(0, 2, 1, 3)
        v = v.reshape(B, S, num_heads, key_size).transpose(0, 2, 1, 3)
        s = jnp.einsum('bhqk,bhtk->bhqt', q, k) / jnp.sqrt(jnp.float32(key_size))
        s = jnp.where(mask[None, None], -jnp.inf, s)
        p = jax.nn.softmax(s, axis=-1)
        a = jnp.einsum('bhqt,bhtk->bhqk', p, v).transpose(0, 2, 1, 3).reshape(B, S, -1)
        a = a @ params['wo'][l] + params['bo'][l]
        x = x + a
        h1 = jnp.maximum(x @ params['w1'][l] + params['b1'][l], 0.0)
        x = x + h1 @ params['w2'][l] + params['b2'][l]
    return x @ params['fc_w'] + params['fc_b']


def init_params(key, *, vocab, seq_len, model_dim, num_heads, key_size,
                ff_dim, num_layers, num_classes):
    HK = num_heads * key_size
    keys = jax.random.split(key, 16)

    def w(k, shape, fan_in):
        return (jax.random.normal(k, shape, jnp.float32) / jnp.sqrt(jnp.float32(fan_in)))

    return {
        'tok_emb': jax.random.normal(keys[0], (vocab, model_dim), jnp.float32) * 0.1,
        'pos_emb': jax.random.normal(keys[1], (seq_len, model_dim), jnp.float32) * 0.1,
        'wq': w(keys[2], (num_layers, model_dim, HK), model_dim),
        'bq': w(keys[3], (num_layers, 1, HK), model_dim),
        'wk': w(keys[4], (num_layers, model_dim, HK), model_dim),
        'bk': w(keys[5], (num_layers, 1, HK), model_dim),
        'wv': w(keys[6], (num_layers, model_dim, HK), model_dim),
        'bv': w(keys[7], (num_layers, 1, HK), model_dim),
        'wo': w(keys[8], (num_layers, HK, model_dim), HK),
        'bo': w(keys[9], (num_layers, 1, model_dim), HK),
        'w1': w(keys[10], (num_layers, model_dim, ff_dim), model_dim),
        'b1': w(keys[11], (num_layers, 1, ff_dim), model_dim),
        'w2': w(keys[12], (num_layers, ff_dim, model_dim), ff_dim),
        'b2': w(keys[13], (num_layers, 1, model_dim), ff_dim),
        'fc_w': w(keys[14], (model_dim, num_classes), model_dim),
        'fc_b': w(keys[15], (1, num_classes), model_dim),
    }


if __name__ == "__main__":
    # Small shapes consistent with the module's forward.
    batch = 2
    seq_len = 8
    model_dim = 32
    num_heads = 4
    key_size = 8          # num_heads * key_size == model_dim (matches o_proj in)
    ff_dim = 64
    num_layers = 2
    num_classes = 16      # num_classes = input_dim (vocab size) per the module
    vocab = num_classes

    key = jax.random.PRNGKey(0)
    pkey, tkey = jax.random.split(key)
    params = init_params(pkey, vocab=vocab, seq_len=seq_len, model_dim=model_dim,
                         num_heads=num_heads, key_size=key_size, ff_dim=ff_dim,
                         num_layers=num_layers, num_classes=num_classes)
    tokens = jax.random.randint(tkey, (batch, seq_len), 0, vocab, dtype=jnp.int32)

    logits = transformer_forward(tokens, params, num_layers=num_layers,
                                 num_heads=num_heads, key_size=key_size)
    logits = jax.block_until_ready(logits)

    ref = reference_forward(tokens, params, num_layers=num_layers,
                            num_heads=num_heads, key_size=key_size)
    ref = jax.block_until_ready(ref)

    assert logits.shape == (batch, seq_len, num_classes)
    assert bool(jnp.all(jnp.isfinite(logits)))
    # bf16 matmuls (f32 accumulate) + approx reciprocal -> loosened tolerance.
    assert bool(jnp.allclose(logits, ref, atol=5e-2, rtol=5e-2))

    print("KERNEL_OK")
</pallas_src>

<mosaic_0001>
module attributes {stable_mosaic.version = 11 : i64} {
  func.func @transformer_layer_kernel(%arg0: i32, %arg1: i32, %arg2: memref<16x32xf32, #tpu.memory_space<vmem>>, %arg3: memref<8x8xf32, #tpu.memory_space<vmem>>, %arg4: memref<1x32x32xbf16, #tpu.memory_space<vmem>>, %arg5: memref<1x32x32xbf16, #tpu.memory_space<vmem>>, %arg6: memref<1x32x32xbf16, #tpu.memory_space<vmem>>, %arg7: memref<1x32x32xbf16, #tpu.memory_space<vmem>>, %arg8: memref<1x32x64xbf16, #tpu.memory_space<vmem>>, %arg9: memref<1x64x32xbf16, #tpu.memory_space<vmem>>, %arg10: memref<1x6x64xf32, #tpu.memory_space<vmem>>, %arg11: memref<16x32xf32, #tpu.memory_space<vmem>>) attributes {dimension_semantics = [#tpu.dimension_semantics<parallel>, #tpu.dimension_semantics<arbitrary>], iteration_bounds = array<i64: 1, 2>, scalar_prefetch = 0 : i64, scratch_operands = 0 : i64, tpu.core_type = #tpu.core_type<tc>, window_params = [{transform_indices = @transform_0, window_bounds = array<i64: 16, 32>}, {pipeline_mode = #tpu.pipeline_mode<synchronous>, transform_indices = @transform_1, window_bounds = array<i64: 8, 8>}, {transform_indices = @transform_2, window_bounds = array<i64: 1, 32, 32>}, {transform_indices = @transform_3, window_bounds = array<i64: 1, 32, 32>}, {transform_indices = @transform_4, window_bounds = array<i64: 1, 32, 32>}, {transform_indices = @transform_5, window_bounds = array<i64: 1, 32, 32>}, {transform_indices = @transform_6, window_bounds = array<i64: 1, 32, 64>}, {transform_indices = @transform_7, window_bounds = array<i64: 1, 64, 32>}, {transform_indices = @transform_8, window_bounds = array<i64: 1, 6, 64>}, {transform_indices = @transform_9, window_bounds = array<i64: 16, 32>}]} {
    %c0_i32 = arith.constant 0 : i32
    %0 = arith.cmpi eq, %arg1, %c0_i32 : i32
    %1 = arith.extui %0 : i1 to i32
    %c0_i32_0 = arith.constant 0 : i32
    %2 = arith.cmpi ne, %1, %c0_i32_0 : i32
    scf.if %2 {
      %c0_37 = arith.constant 0 : index
      %c0_38 = arith.constant 0 : index
      %111 = vector.load %arg2[%c0_37, %c0_38] : memref<16x32xf32, #tpu.memory_space<vmem>>, vector<16x32xf32>
      %c0_39 = arith.constant 0 : index
      %c0_40 = arith.constant 0 : index
      %112 = vector.load %arg11[%c0_39, %c0_40] : memref<16x32xf32, #tpu.memory_space<vmem>>, vector<16x32xf32>
      tpu.vector_store %arg11[%c0_39, %c0_40], %111 {strides = array<i32>} : memref<16x32xf32, #tpu.memory_space<vmem>>, vector<16x32xf32>,
    } else {
    }
    %c0 = arith.constant 0 : index
    %c0_1 = arith.constant 0 : index
    %3 = vector.load %arg11[%c0, %c0_1] : memref<16x32xf32, #tpu.memory_space<vmem>>, vector<16x32xf32>
    %4 = arith.truncf %3 : vector<16x32xf32> to vector<16x32xbf16>
    %c0_2 = arith.constant 0 : index
    %c0_3 = arith.constant 0 : index
    %c0_4 = arith.constant 0 : index
    %5 = vector.load %arg10[%c0_2, %c0_3, %c0_4] : memref<1x6x64xf32, #tpu.memory_space<vmem>>, vector<1x6x64xf32>
    %6 = vector.shape_cast %5 : vector<1x6x64xf32> to vector<6x64xf32>
    %7 = vector.extract_strided_slice %6 {offsets = [0, 0], sizes = [1, 32], strides = [1, 1]} : vector<6x64xf32> to vector<1x32xf32>
    %8 = vector.extract_strided_slice %6 {offsets = [1, 0], sizes = [1, 32], strides = [1, 1]} : vector<6x64xf32> to vector<1x32xf32>
    %9 = vector.extract_strided_slice %6 {offsets = [2, 0], sizes = [1, 32], strides = [1, 1]} : vector<6x64xf32> to vector<1x32xf32>
    %10 = vector.extract_strided_slice %6 {offsets = [3, 0], sizes = [1, 32], strides = [1, 1]} : vector<6x64xf32> to vector<1x32xf32>
    %11 = vector.extract_strided_slice %6 {offsets = [4, 0], sizes = [1, 64], strides = [1, 1]} : vector<6x64xf32> to vector<1x64xf32>
    %12 = vector.extract_strided_slice %6 {offsets = [5, 0], sizes = [1, 32], strides = [1, 1]} : vector<6x64xf32> to vector<1x32xf32>
    %c0_5 = arith.constant 0 : index
    %c0_6 = arith.constant 0 : index
    %c0_7 = arith.constant 0 : index
    %13 = vector.load %arg4[%c0_5, %c0_6, %c0_7] : memref<1x32x32xbf16, #tpu.memory_space<vmem>>, vector<1x32x32xbf16>
    %14 = vector.shape_cast %13 : vector<1x32x32xbf16> to vector<32x32xbf16>
    %cst = arith.constant dense<0.000000e+00> : vector<16x32xf32>
    %15 = tpu.matmul %4, %14, %cst {dimension_numbers = #tpu.dot_dimension_numbers<[1], [0], [0], [1], [0, 0, 1, 1], [], []>} : vector<16x32xbf16>, vector<32x32xbf16>, vector<16x32xf32> -> vector<16x32xf32>
    %16 = vector.broadcast %7 : vector<1x32xf32> to vector<16x32xf32>
    %17 = arith.addf %15, %16 : vector<16x32xf32>
    %c0_8 = arith.constant 0 : index
    %c0_9 = arith.constant 0 : index
    %c0_10 = arith.constant 0 : index
    %18 = vector.load %arg5[%c0_8, %c0_9, %c0_10] : memref<1x32x32xbf16, #tpu.memory_space<vmem>>, vector<1x32x32xbf16>
    %19 = vector.shape_cast %18 : vector<1x32x32xbf16> to vector<32x32xbf16>
    %cst_11 = arith.constant dense<0.000000e+00> : vector<16x32xf32>
    %20 = tpu.matmul %4, %19, %cst_11 {dimension_numbers = #tpu.dot_dimension_numbers<[1], [0], [0], [1], [0, 0, 1, 1], [], []>} : vector<16x32xbf16>, vector<32x32xbf16>, vector<16x32xf32> -> vector<16x32xf32>
    %21 = vector.broadcast %8 : vector<1x32xf32> to vector<16x32xf32>
    %22 = arith.addf %20, %21 : vector<16x32xf32>
    %c0_12 = arith.constant 0 : index
    %c0_13 = arith.constant 0 : index
    %c0_14 = arith.constant 0 : index
    %23 = vector.load %arg6[%c0_12, %c0_13, %c0_14] : memref<1x32x32xbf16, #tpu.memory_space<vmem>>, vector<1x32x32xbf16>
    %24 = vector.shape_cast %23 : vector<1x32x32xbf16> to vector<32x32xbf16>
    %cst_15 = arith.constant dense<0.000000e+00> : vector<16x32xf32>
    %25 = tpu.matmul %4, %24, %cst_15 {dimension_numbers = #tpu.dot_dimension_numbers<[1], [0], [0], [1], [0, 0, 1, 1], [], []>} : vector<16x32xbf16>, vector<32x32xbf16>, vector<16x32xf32> -> vector<16x32xf32>
    %26 = vector.broadcast %9 : vector<1x32xf32> to vector<16x32xf32>
    %27 = arith.addf %25, %26 : vector<16x32xf32>
    %28 = vector.extract_strided_slice %17 {offsets = [0, 0], sizes = [16, 8], strides = [1, 1]} : vector<16x32xf32> to vector<16x8xf32>
    %29 = vector.extract_strided_slice %17 {offsets = [0, 8], sizes = [16, 8], strides = [1, 1]} : vector<16x32xf32> to vector<16x8xf32>
    %30 = vector.extract_strided_slice %17 {offsets = [0, 16], sizes = [16, 8], strides = [1, 1]} : vector<16x32xf32> to vector<16x8xf32>
    %31 = vector.extract_strided_slice %17 {offsets = [0, 24], sizes = [16, 8], strides = [1, 1]} : vector<16x32xf32> to vector<16x8xf32>
    %32 = vector.shape_cast %28 : vector<16x8xf32> to vector<1x16x8xf32>
    %33 = vector.shape_cast %29 : vector<16x8xf32> to vector<1x16x8xf32>
    %34 = vector.shape_cast %30 : vector<16x8xf32> to vector<1x16x8xf32>
    %35 = vector.shape_cast %31 : vector<16x8xf32> to vector<1x16x8xf32>
    %36 = tpu.concatenate %32, %33, %34, %35 in 0 : vector<1x16x8xf32>, vector<1x16x8xf32>, vector<1x16x8xf32>, vector<1x16x8xf32> -> vector<4x16x8xf32>
    %37 = vector.shape_cast %36 : vector<4x16x8xf32> to vector<8x8x8xf32>
    %38 = arith.truncf %37 : vector<8x8x8xf32> to vector<8x8x8xbf16>
    %39 = vector.extract_strided_slice %22 {offsets = [0, 0], sizes = [16, 8], strides = [1, 1]} : vector<16x32xf32> to vector<16x8xf32>
    %40 = vector.extract_strided_slice %22 {offsets = [0, 8], sizes = [16, 8], strides = [1, 1]} : vector<16x32xf32> to vector<16x8xf32>
    %41 = vector.extract_strided_slice %22 {offsets = [0, 16], sizes = [16, 8], strides = [1, 1]} : vector<16x32xf32> to vector<16x8xf32>
    %42 = vector.extract_strided_slice %22 {offsets = [0, 24], sizes = [16, 8], strides = [1, 1]} : vector<16x32xf32> to vector<16x8xf32>
    %43 = vector.shape_cast %39 : vector<16x8xf32> to vector<1x16x8xf32>
    %44 = vector.shape_cast %40 : vector<16x8xf32> to vector<1x16x8xf32>
    %45 = vector.shape_cast %41 : vector<16x8xf32> to vector<1x16x8xf32>
    %46 = vector.shape_cast %42 : vector<16x8xf32> to vector<1x16x8xf32>
    %47 = tpu.concatenate %43, %44, %45, %46 in 0 : vector<1x16x8xf32>, vector<1x16x8xf32>, vector<1x16x8xf32>, vector<1x16x8xf32> -> vector<4x16x8xf32>
    %48 = vector.shape_cast %47 : vector<4x16x8xf32> to vector<8x8x8xf32>
    %49 = arith.truncf %48 : vector<8x8x8xf32> to vector<8x8x8xbf16>
    %50 = vector.extract_strided_slice %27 {offsets = [0, 0], sizes = [16, 8], strides = [1, 1]} : vector<16x32xf32> to vector<16x8xf32>
    %51 = vector.extract_strided_slice %27 {offsets = [0, 8], sizes = [16, 8], strides = [1, 1]} : vector<16x32xf32> to vector<16x8xf32>
    %52 = vector.extract_strided_slice %27 {offsets = [0, 16], sizes = [16, 8], strides = [1, 1]} : vector<16x32xf32> to vector<16x8xf32>
    %53 = vector.extract_strided_slice %27 {offsets = [0, 24], sizes = [16, 8], strides = [1, 1]} : vector<16x32xf32> to vector<16x8xf32>
    %54 = vector.shape_cast %50 : vector<16x8xf32> to vector<1x16x8xf32>
    %55 = vector.shape_cast %51 : vector<16x8xf32> to vector<1x16x8xf32>
    %56 = vector.shape_cast %52 : vector<16x8xf32> to vector<1x16x8xf32>
    %57 = vector.shape_cast %53 : vector<16x8xf32> to vector<1x16x8xf32>
    %58 = tpu.concatenate %54, %55, %56, %57 in 0 : vector<1x16x8xf32>, vector<1x16x8xf32>, vector<1x16x8xf32>, vector<1x16x8xf32> -> vector<4x16x8xf32>
    %59 = vector.shape_cast %58 : vector<4x16x8xf32> to vector<8x8x8xf32>
    %60 = arith.truncf %59 : vector<8x8x8xf32> to vector<8x8x8xbf16>
    %cst_16 = arith.constant dense<0.000000e+00> : vector<8x8x8xf32>
    %61 = tpu.matmul %38, %49, %cst_16 {dimension_numbers = #tpu.dot_dimension_numbers<[2], [2], [1], [1], [0, 0, 0, 1, 1, 1], [0], [0]>} : vector<8x8x8xbf16>, vector<8x8x8xbf16>, vector<8x8x8xf32> -> vector<8x8x8xf32>
    %c0_17 = arith.constant 0 : index
    %c0_18 = arith.constant 0 : index
    %62 = vector.load %arg3[%c0_17, %c0_18] : memref<8x8xf32, #tpu.memory_space<vmem>>, vector<8x8xf32>
    %63 = vector.shape_cast %62 : vector<8x8xf32> to vector<1x8x8xf32>
    %64 = vector.broadcast %63 : vector<1x8x8xf32> to vector<8x8x8xf32>
    %65 = arith.addf %61, %64 : vector<8x8x8xf32>
    %cst_19 = arith.constant dense<0xFF800000> : vector<8x8xf32>
    %66 = vector.multi_reduction <maximumf>, %65, %cst_19 [2] : vector<8x8x8xf32> to vector<8x8xf32>
    %67 = vector.shape_cast %66 : vector<8x8xf32> to vector<8x8x1xf32>
    %68 = vector.broadcast %67 : vector<8x8x1xf32> to vector<8x8x8xf32>
    %69 = arith.subf %65, %68 : vector<8x8x8xf32>
    %70 = math.exp %69 : vector<8x8x8xf32>
    %cst_20 = arith.constant dense<0.000000e+00> : vector<8x8xf32>
    %71 = vector.multi_reduction <add>, %70, %cst_20 [2] : vector<8x8x8xf32> to vector<8x8xf32>
    %72 = vector.shape_cast %71 : vector<8x8xf32> to vector<8x8x1xf32>
    %73 = tpu.reciprocal %72 {approx = true} : vector<8x8x1xf32> -> vector<8x8x1xf32>
    %74 = vector.broadcast %73 : vector<8x8x1xf32> to vector<8x8x8xf32>
    %75 = arith.mulf %70, %74 : vector<8x8x8xf32>
    %76 = arith.truncf %75 : vector<8x8x8xf32> to vector<8x8x8xbf16>
    %cst_21 = arith.constant dense<0.000000e+00> : vector<8x8x8xf32>
    %77 = tpu.matmul %76, %60, %cst_21 {dimension_numbers = #tpu.dot_dimension_numbers<[2], [1], [1], [2], [0, 0, 0, 1, 1, 2], [0], [0]>} : vector<8x8x8xbf16>, vector<8x8x8xbf16>, vector<8x8x8xf32> -> vector<8x8x8xf32>
    %78 = vector.shape_cast %77 : vector<8x8x8xf32> to vector<4x16x8xf32>
    %79 = vector.extract_strided_slice %78 {offsets = [0, 0, 0], sizes = [1, 16, 8], strides = [1, 1, 1]} : vector<4x16x8xf32> to vector<1x16x8xf32>
    %80 = vector.shape_cast %79 : vector<1x16x8xf32> to vector<16x8xf32>
    %81 = vector.extract_strided_slice %78 {offsets = [1, 0, 0], sizes = [1, 16, 8], strides = [1, 1, 1]} : vector<4x16x8xf32> to vector<1x16x8xf32>
    %82 = vector.shape_cast %81 : vector<1x16x8xf32> to vector<16x8xf32>
    %83 = vector.extract_strided_slice %78 {offsets = [2, 0, 0], sizes = [1, 16, 8], strides = [1, 1, 1]} : vector<4x16x8xf32> to vector<1x16x8xf32>
    %84 = vector.shape_cast %83 : vector<1x16x8xf32> to vector<16x8xf32>
    %85 = vector.extract_strided_slice %78 {offsets = [3, 0, 0], sizes = [1, 16, 8], strides = [1, 1, 1]} : vector<4x16x8xf32> to vector<1x16x8xf32>
    %86 = vector.shape_cast %85 : vector<1x16x8xf32> to vector<16x8xf32>
    %87 = tpu.concatenate %80, %82, %84, %86 in 1 : vector<16x8xf32>, vector<16x8xf32>, vector<16x8xf32>, vector<16x8xf32> -> vector<16x32xf32>
    %88 = arith.truncf %87 : vector<16x32xf32> to vector<16x32xbf16>
    %c0_22 = arith.constant 0 : index
    %c0_23 = arith.constant 0 : index
    %c0_24 = arith.constant 0 : index
    %89 = vector.load %arg7[%c0_22, %c0_23, %c0_24] : memref<1x32x32xbf16, #tpu.memory_space<vmem>>, vector<1x32x32xbf16>
    %90 = vector.shape_cast %89 : vector<1x32x32xbf16> to vector<32x32xbf16>
    %cst_25 = arith.constant dense<0.000000e+00> : vector<16x32xf32>
    %91 = tpu.matmul %88, %90, %cst_25 {dimension_numbers = #tpu.dot_dimension_numbers<[1], [0], [0], [1], [0, 0, 1, 1], [], []>} : vector<16x32xbf16>, vector<32x32xbf16>, vector<16x32xf32> -> vector<16x32xf32>
    %92 = vector.broadcast %10 : vector<1x32xf32> to vector<16x32xf32>
    %93 = arith.addf %91, %92 : vector<16x32xf32>
    %94 = arith.addf %3, %93 : vector<16x32xf32>
    %95 = arith.truncf %94 : vector<16x32xf32> to vector<16x32xbf16>
    %c0_26 = arith.constant 0 : index
    %c0_27 = arith.constant 0 : index
    %c0_28 = arith.constant 0 : index
    %96 = vector.load %arg8[%c0_26, %c0_27, %c0_28] : memref<1x32x64xbf16, #tpu.memory_space<vmem>>, vector<1x32x64xbf16>
    %97 = vector.shape_cast %96 : vector<1x32x64xbf16> to vector<32x64xbf16>
    %cst_29 = arith.constant dense<0.000000e+00> : vector<16x64xf32>
    %98 = tpu.matmul %95, %97, %cst_29 {dimension_numbers = #tpu.dot_dimension_numbers<[1], [0], [0], [1], [0, 0, 1, 1], [], []>} : vector<16x32xbf16>, vector<32x64xbf16>, vector<16x64xf32> -> vector<16x64xf32>
    %99 = vector.broadcast %11 : vector<1x64xf32> to vector<16x64xf32>
    %100 = arith.addf %98, %99 : vector<16x64xf32>
    %cst_30 = arith.constant 0.000000e+00 : f32
    %101 = vector.broadcast %cst_30 : f32 to vector<16x64xf32>
    %102 = arith.maximumf %100, %101 : vector<16x64xf32>
    %103 = arith.truncf %102 : vector<16x64xf32> to vector<16x64xbf16>
    %c0_31 = arith.constant 0 : index
    %c0_32 = arith.constant 0 : index
    %c0_33 = arith.constant 0 : index
    %104 = vector.load %arg9[%c0_31, %c0_32, %c0_33] : memref<1x64x32xbf16, #tpu.memory_space<vmem>>, vector<1x64x32xbf16>
    %105 = vector.shape_cast %104 : vector<1x64x32xbf16> to vector<64x32xbf16>
    %cst_34 = arith.constant dense<0.000000e+00> : vector<16x32xf32>
    %106 = tpu.matmul %103, %105, %cst_34 {dimension_numbers = #tpu.dot_dimension_numbers<[1], [0], [0], [1], [0, 0, 1, 1], [], []>} : vector<16x64xbf16>, vector<64x32xbf16>, vector<16x32xf32> -> vector<16x32xf32>
    %107 = arith.addf %94, %106 : vector<16x32xf32>
    %108 = vector.broadcast %12 : vector<1x32xf32> to vector<16x32xf32>
    %109 = arith.addf %107, %108 : vector<16x32xf32>
    %c0_35 = arith.constant 0 : index
    %c0_36 = arith.constant 0 : index
    %110 = vector.load %arg11[%c0_35, %c0_36] : memref<16x32xf32, #tpu.memory_space<vmem>>, vector<16x32xf32>
    tpu.vector_store %arg11[%c0_35, %c0_36], %109 {strides = array<i32>} : memref<16x32xf32, #tpu.memory_space<vmem>>, vector<16x32xf32>,
    return
  }
  func.func @transform_0(%arg0: i32, %arg1: i32) -> (i32, i32) {
    %c0_i32 = arith.constant 0 : i32
    %c0_i32_0 = arith.constant 0 : i32
    return %arg0, %c0_i32 : i32, i32
  }
  func.func @transform_1(%arg0: i32, %arg1: i32) -> (i32, i32) {
    %c0_i32 = arith.constant 0 : i32
    %c0_i32_0 = arith.constant 0 : i32
    %c0_i32_1 = arith.constant 0 : i32
    return %c0_i32, %c0_i32_0 : i32, i32
  }
  func.func @transform_2(%arg0: i32, %arg1: i32) -> (i32, i32, i32) {
    %c0_i32 = arith.constant 0 : i32
    %c0_i32_0 = arith.constant 0 : i32
    %c0_i32_1 = arith.constant 0 : i32
    return %arg1, %c0_i32, %c0_i32_0 : i32, i32, i32
  }
  func.func @transform_3(%arg0: i32, %arg1: i32) -> (i32, i32, i32) {
    %c0_i32 = arith.constant 0 : i32
    %c0_i32_0 = arith.constant 0 : i32
    %c0_i32_1 = arith.constant 0 : i32
    return %arg1, %c0_i32, %c0_i32_0 : i32, i32, i32
  }
  func.func @transform_4(%arg0: i32, %arg1: i32) -> (i32, i32, i32) {
    %c0_i32 = arith.constant 0 : i32
    %c0_i32_0 = arith.constant 0 : i32
    %c0_i32_1 = arith.constant 0 : i32
    return %arg1, %c0_i32, %c0_i32_0 : i32, i32, i32
  }
  func.func @transform_5(%arg0: i32, %arg1: i32) -> (i32, i32, i32) {
    %c0_i32 = arith.constant 0 : i32
    %c0_i32_0 = arith.constant 0 : i32
    %c0_i32_1 = arith.constant 0 : i32
    return %arg1, %c0_i32, %c0_i32_0 : i32, i32, i32
  }
  func.func @transform_6(%arg0: i32, %arg1: i32) -> (i32, i32, i32) {
    %c0_i32 = arith.constant 0 : i32
    %c0_i32_0 = arith.constant 0 : i32
    %c0_i32_1 = arith.constant 0 : i32
    return %arg1, %c0_i32, %c0_i32_0 : i32, i32, i32
  }
  func.func @transform_7(%arg0: i32, %arg1: i32) -> (i32, i32, i32) {
    %c0_i32 = arith.constant 0 : i32
    %c0_i32_0 = arith.constant 0 : i32
    %c0_i32_1 = arith.constant 0 : i32
    return %arg1, %c0_i32, %c0_i32_0 : i32, i32, i32
  }
  func.func @transform_8(%arg0: i32, %arg1: i32) -> (i32, i32, i32) {
    %c0_i32 = arith.constant 0 : i32
    %c0_i32_0 = arith.constant 0 : i32
    %c0_i32_1 = arith.constant 0 : i32
    return %arg1, %c0_i32, %c0_i32_0 : i32, i32, i32
  }
  func.func @transform_9(%arg0: i32, %arg1: i32) -> (i32, i32) {
    %c0_i32 = arith.constant 0 : i32
    %c0_i32_0 = arith.constant 0 : i32
    return %arg0, %c0_i32 : i32, i32
  }
}

</mosaic_0001>

<bundles_post_ra>
// kernel: tpu_custom_call.1
= control target key start
LH: loop header
LB: loop body
LE: loop exit
PB: predicated region body
PF: predicated region fallthrough
CT: control target
= control target key end

     0   :  { %s3171_s0 = inlined_call_operand.hbm [shape: f32[16,32], index: 0, kind: input, shape index: {}]   ;;  %s3172_s1 = inlined_call_operand.vmem [shape: f32[8,8], index: 1, kind: input, shape index: {}]   ;;  %s3173_s2 = inlined_call_operand.vmem [shape: bf16[2,32,32], index: 2, kind: input, shape index: {}]   ;;  %s3174_s3 = inlined_call_operand.vmem [shape: bf16[2,32,32], index: 3, kind: input, shape index: {}]   ;;  %s3175_s4 = inlined_call_operand.vmem [shape: bf16[2,32,32], index: 4, kind: input, shape index: {}]   ;;  %s3176_s5 = inlined_call_operand.hbm [shape: bf16[2,32,32], index: 5, kind: input, shape index: {}]   ;;  %s3177_s6 = inlined_call_operand.hbm [shape: bf16[2,32,64], index: 6, kind: input, shape index: {}]   ;;  %s3178_s7 = inlined_call_operand.vmem [shape: bf16[2,64,32], index: 7, kind: input, shape index: {}]   ;;  %s3179_s8 = inlined_call_operand.vmem [shape: f32[2,6,64], index: 8, kind: input, shape index: {}]   ;;  %s3180_s9 = inlined_call_operand.hbm [shape: f32[16,32], index: 9, kind: output, shape index: {}]  }
   0x1   :  { %3185 = sst [smem:[#allocation15_spill]] %s3171_s0 }
   0x2   :  { %3186 = sst [smem:[#allocation16_spill]] %s3176_s5 }
   0x3   :  { %3187 = sst [smem:[#allocation17_spill]] %s3177_s6 }
   0x4   :  { %14 = vsyncpa [#allocation3], 0 }
   0x5   :  { %15 = vsyncpa [#allocation6], 0 }
   0x6   :  { %17 = vsyncpa [#allocation6 + $0x1], 0 }
   0x7   :  { %18 = vsyncpa [#allocation4], 0  ;;  %s2756_s30 = smov 0   ;;  %s2758_s10 = smov 0  }
   0x8   :  { %s2760_s11 = smov 0   ;;  %s2762_s12 = smov 0  }
   0x9   :  { %s2764_s13 = smov 0   ;;  %s2766_s14 = smov 0  }
   0xa LB: > { %3188 = sst [smem:[#allocation12_spill]] %s2683_s13  ;;  %s33_s15 = sadd.s32 1, %s2683_s13  ;;  %s2687_s14 = sphi %s2766_s14, %s24_s14   ;;  %s2683_s13 = sphi %s2764_s13, %s3204_s13   ;;  %s2679_s12 = sphi %s2762_s12, %s3203_s12   ;;  %s2675_s11 = sphi %s2760_s11, %s3207_s11   ;;  %s2671_s10 = sphi %s2758_s10, %s3206_s10   ;;  %s2667_s30 = sphi %s2756_s30, %s3205_s30  }
   0xb   : > { %s168_s16 = sadd.s32 1, %s2675_s11  ;;  %p34_p0 = scmp.ge.s32.totalorder %s33_s15, 2 }
   0xc   : > { %p175_p1 = scmp.ne.s32.totalorder %s2675_s11, %s2671_s10  ;;  %p176_p2 = scmp.eq.s32.totalorder %s2687_s14, 0 }
   0xd   : > { %s3209_s15 = smov (%p34_p0, %s33_s15), 0  ;;  %p2350_p4 = scmp.lt.s32.totalorder %s2687_s14, 2 }
   0xe   : > { %3189 = sst [smem:[#allocation13_spill]] %s3209_s15  ;;  %p177_p3 = por %p176_p2, %p175_p1 }
   0xf   : > { %s165_s17 = ssub.s32 %s2683_s13, %s3209_s15  ;;  %s352_s18 = sand.u32 1, %s2687_s14  }
  0x10   : > { %p166_p5 = scmp.eq.s32.totalorder %s165_s17, 0  ;;  %s354_s19 = sand.u32 1, %s2675_s11  }
  0x11   : > { %s2120_s20 = sshll.u32 %s2683_s13, 8  ;;  %s2060_s22 = sshll.u32 %s354_s19, 4 }
  0x12   : > { %s2800_s21 = scalar_select %p166_p5, %s2675_s11, %s168_s16  }
  0x13   : > { %s3191_s5 = sld [smem:[#allocation16_spill]]  ;;  %p2807_p6 = pnand %p2350_p4, %p177_p3 }
  0x14   : > { %3190 = sst [smem:[#allocation14_spill]] %s2800_s21  ;;  %s356_s27 = scalar_lea.vmem [#allocation5], %s2060_s22 }
  0x15   : > { %s363_s28 = sshll.u32 %s356_s27, 4  ;;  %s2811_s29 = scalar_lea.sflag [#allocation6], %s352_s18  ;;  %s364_s28 = int_to_ptr.vmem [resolvable:$true] %s363_s28 }
  0x16   : > { %p2525_p7 = pneg %p2807_p6  ;;  %s2536_s16 = scalar_lea.vmem %s364_s28, 256 }
  0x17   : > { %p2537_p8 = scmp.ne.s32.totalorder %s364_s28, %s2536_s16  ;;  %s2689_s17 = smov [#allocation5]  }
  0x18   : > { %s2541_s19 = sshll.u32 %s2689_s17, 4  ;;  %s2542_s19 = int_to_ptr.vmem [resolvable:$false] %s2541_s19 }
  0x19   : > { %s362_s25 = scalar_lea.hbm %s3191_s5, %s2120_s20  ;;  %p2539_p9 = pnand %p2537_p8, %p2525_p7 }
  0x1a   : > { %s2543_s23 = scalar_lea.vmem %s2542_s19, 512  ;;  %p2544_p11 = scmp.lt.s32.totalorder %s364_s28, %s2542_s19 }
  0x1b   : > { %p2540_p10 = pneg %p2539_p9  ;;  %p2545_p12 = scmp.lt.s32.totalorder %s2543_s23, %s2536_s16 }
  0x1d   : > { %p2546_p13 = por %p2545_p12, %p2544_p11 }
  0x1f   : > { %p2547_p0 = pnand %p2546_p13, %p2540_p10 }
  0x21   : > { %2550 = shalt.err (!%p2547_p0)
}
  0x22   : > { %s3181_s24 = smov 64   ;;  %s3182_s18 = smov 4  }
  0x23   : > { %2345 = dma.hbm_to_vmem [thread:$0]  (!%p2807_p6), %s362_s25, 256, %s364_s28, %s2811_s29, %s3181_s24, %s3181_s24, %s3182_s18  }
  0x24   : > { %s377_s27 = scalar_lea.vmem [#allocation7], %s2060_s22  ;;  %s2825_s17 = sadd.s32 4294967295, %s2687_s14  }
  0x25   : > { %s384_s16 = sshll.u32 %s377_s27, 4  ;;  %p181_p1 = scmp.ne.s32.totalorder %s2671_s10, %s2667_s30  ;;  %s385_s16 = int_to_ptr.vmem [resolvable:$true] %s384_s16 }
  0x26   : > { %p182_p2 = scmp.eq.s32.totalorder %s2825_s17, 0  ;;  %p2057_p3 = scmp.ge.s32.totalorder %s2687_s14, 1 }
  0x27   : > { %p296_p4 = scmp.lt.s32.totalorder %s2687_s14, 3  ;;  %s3195_s6 = sld [smem:[#allocation17_spill]] }
  0x28   : > { %p2834_p5 = por %p182_p2, %p181_p1  ;;  %s2692_s27 = smov [#allocation2]  }
  0x29   : > { %p2838_p8 = pnand %p2057_p3, %p296_p4  ;;  %s311_s30 = sshll.u32 %s2692_s27, 4  ;;  %s2849_s30 = int_to_ptr.vmem [resolvable:$true] %s311_s30 }
  0x2a   : > { %s2564_s18 = scalar_lea.vmem %s385_s16, 256  ;;  %s2693_s22 = smov [#allocation7]  }
  0x2b   : > { %p2338_p9 = pneg %p2838_p8  ;;  %p2565_p11 = scmp.ne.s32.totalorder %s385_s16, %s2564_s18 }
  0x2d   : > { %s383_s28 = scalar_lea.hbm %s3195_s6, %s2120_s20  ;;  %p2853_p10 = pnand %p2338_p9, %p182_p2 }
  0x2e   : > { %p2567_p12 = pnand %p2565_p11, %p2525_p7  ;;  %s2569_s20 = sshll.u32 %s2693_s22, 4  ;;  %s2570_s20 = int_to_ptr.vmem [resolvable:$false] %s2569_s20 }
  0x2f   : > { %s2571_s25 = scalar_lea.vmem %s2570_s20, 512  ;;  %p2572_p0 = scmp.lt.s32.totalorder %s385_s16, %s2570_s20 }
  0x30   : > { %p2568_p13 = pneg %p2567_p12  ;;  %p2573_p1 = scmp.lt.s32.totalorder %s2571_s25, %s2564_s18 }
  0x32   : > { %p2574_p3 = por %p2573_p1, %p2572_p0 }
  0x34   : > { %p2575_p4 = pnand %p2574_p3, %p2568_p13 }
  0x36   : > { %2578 = shalt.err (!%p2575_p4)
}
  0x37   : > { %s3197_s27 = smov 4   ;;  %s3198_s5 = smov 64  }
  0x38   : > { %2348 = dma.hbm_to_vmem [thread:$0]  (!%p2807_p6), %s383_s28, 256, %s385_s16, %s2811_s29, %s3198_s5, %s3198_s5, %s3197_s27  }
  0x39   : > { %p2581_p7 = pneg %p2853_p10  ;;  %s2590_s22 = scalar_lea.vmem %s2849_s30, 256 }
  0x3a   : > { %p2591_p9 = scmp.ne.s32.totalorder %s2849_s30, %s2590_s22  ;;  %p2598_p13 = scmp.lt.s32.totalorder %s2849_s30, %s2849_s30 }
  0x3b   : > { %p2599_p0 = scmp.lt.s32.totalorder %s2590_s22, %s2590_s22 }
  0x3c   : > { %p2593_p11 = pnand %p2591_p9, %p2581_p7 }
  0x3d   : > { %p2600_p1 = por %p2599_p0, %p2598_p13 }
  0x3e   : > { %p2594_p12 = pneg %p2593_p11 }
  0x40   : > { %p2601_p3 = pnand %p2600_p1, %p2594_p12 }
  0x42   : > { %2604 = shalt.err (!%p2601_p3)
}
  0x43   : > { %s2694_s26 = smov 128   ;;  %s2695_s18 = smov 8  }
  0x44   : > { %s3199_s0 = sld [smem:[#allocation15_spill]] }
  0x46   : > { %411 = sbr.rel (%p2838_p8) target bundleno = 1887 (0x75f), region = 56 }
  0x4a   : > { %2341 = dma.hbm_to_vmem [thread:$0]  (!%p2853_p10), %s3199_s0, 256, %s2849_s30, [#allocation3], %s2694_s26, %s2694_s26, %s2695_s18  }
  0x4b   : > { %2654 = dma.done.wait (%p182_p2), [#allocation3], 256  }
  0x4c   : > { %2656 = vsyncadd (%p182_p2), [#allocation3], 4294967040  ;;  %s417_s5 = sand.u32 1, %s2825_s17   ;;  %s419_s29 = sand.u32 1, %s2671_s10  }
  0x4d   : > { %s2886_s16 = sshll.u32 %s419_s29, 4  ;;  %s418_s24 = scalar_lea.sflag [#allocation6], %s417_s5 }
  0x4e   : > { %2658 = dma.done.wait (%p2834_p5), %s418_s24, 512  }
  0x4f   : > { %2660 = vsyncadd (%p2834_p5), %s418_s24, 4294966784  ;;  %p490_p6 = scmp.lt.s32.totalorder %s2679_s12, 1  ;;  %s430_s26 = scalar_lea.vmem [#allocation7], %s2886_s16 }
  0x50   : > { %p2079_p2 = scmp.ne.s32.totalorder %s2679_s12, 0 }
  0x51   : > { %s491_s23 = scalar_select %p490_p6, %s2679_s12, 1 }
  0x53   : > { %s2122_s30 = sshll.u32 %s491_s23, 4  ;;  %s2125_s27 = sshll.u32 %s491_s23, 5 }
  0x54   : > { %s494_s18 = scalar_lea.vmem %s3173_s2, %s2122_s30  ;;  %s499_s5 = scalar_lea.vmem %s3174_s3, %s2122_s30 }
  0x55   : > { %s2904_s19 = scalar_lea.vmem %s3175_s4, %s2122_s30  ;;  %s2909_s6 = scalar_lea.vmem %s3178_s7, %s2125_s27 }
  0x56   : > { %s2078_s15 = sshll.u32 %s491_s23, 3  ;;  %519 = sbr.rel (%p2079_p2) target bundleno = 93 (0x5d), region = 72 }
  0x57   : > { %s2914_s22 = scalar_lea.vmem %s3179_s8, %s2078_s15 }
  0x5b   : > { %v520_v0 = vld [vmem:[#allocation2] sm:$0xff]  ;;  %vm522_vm0 = vcmask 261120   ;;  %v521_v1 = vld [vmem:[#allocation2 + $0x8] sm:$0xff] }
  0x5c   : > { %523 = vst.msk [vmem:[#allocation8] sm:$0xff] %vm522_vm0, %v520_v0  ;;  %524 = vst.msk [vmem:[#allocation8 + $0x8] sm:$0xff] %vm522_vm0, %v521_v1 }
  0x5d PF: > { %v2477_v2 = vld [vmem:[%s499_s5 + $0x8] sm:$0xff]   ;;  %v2696_v3 = vmov 0.0   ;;  %v2479_v5 = vld [vmem:[%s499_s5] sm:$0xff]   ;;  %vm2697_vm1 = vmmov 0   ;;  %vm549_vm2 = vcmask 261120   ;;  %v533_v12 = vlaneseq  ;;  %s2698_s0 = smov 112  }
  0x5e   : > { %2186 = vmatprep.subr.bf16.mxu1 %v2696_v3  ;;  %2178 = vmatprep.subr.bf16.mxu0 %v2696_v3  ;;  %v2478_v4 = vld [vmem:[%s494_s18 + $0x8] sm:$0xff]   ;;  %v2480_v6 = vld [vmem:[%s494_s18] sm:$0xff]   ;;  %vm801_vm3 = vcmask 64512   ;;  %s2699_s12 = smov 120   ;;  %s2700_s13 = smov 104   ;;  %vm1269_vm4 = vcmask 1043456  }
  0x5f   : > { %2187 = vmatpush3.bf16.msra.mxu1 %v2477_v2  ;;  %2190 = vmatprep.mubr.msk.bf16.mxu1 %vm2697_vm1, %v2696_v3  ;;  %v2481_v10 = vld [vmem:[%s2904_s19 + $0x8] sm:$0xff]   ;;  %v2482_v11 = vld [vmem:[%s2904_s19] sm:$0xff]   ;;  %v2947_v13 = vshrl.u32 %v533_v12, 7  ;;  %s3200_s28 = scalar_lea.vmem [#allocation5], %s2886_s16  ;;  %s2701_s23 = smov 8   ;;  %vm1661_vm5 = vcmask 130048  }
  0x60   : > { %2179 = vmatpush3.bf16.msra.mxu0 %v2478_v4  ;;  %2188 = vmatprep.subr.bf16.mxu1 %v2696_v3  ;;  %v2951_v15 = vld [vmem:[%s2914_s22] sm:$0x3f]  ;;  %s3201_s30 = smov %s3200_s28  ;;  %s2702_s27 = smov 16   ;;  %vm1664_vm6 = vcmask 195584   ;;  %vm1834_vm7 = vcmask 523264  }
  0x61   : > { %2180 = vmatprep.subr.bf16.mxu0 %v2696_v3  ;;  %2182 = vmatprep.mubr.msk.bf16.mxu0 %vm2697_vm1, %v2696_v3  ;;  %v600_v14 = vsub.s32 1, %v2947_v13  ;;  %v535_v17 = vsub.s32 0, %v2947_v13  ;;  %v661_v61 = vsub.s32 2, %v2947_v13  ;;  %s2703_s18 = smov 24   ;;  %p2352_p5 = scmp.eq.s32.totalorder %s2825_s17, 1 }
  0x63   : > { %v2924_v7 = vld [vmem:[#allocation8] sm:$0xff]  ;;  %v2926_v8 = vld [vmem:[#allocation8 + $0x8] sm:$0xff]  ;;  %2189 = vmatpush3.bf16.msra.mxu1 %v2479_v5  ;;  %v601_v16 = vrot.slane %v2951_v15, %v600_v14  ;;  %v536_v20 = vrot.slane %v2951_v15, %v535_v17 }
  0x64   : > { %v527_v9 = vpack.c.bf16 %v2926_v8, %v2924_v7  ;;  %2181 = vmatpush3.bf16.msra.mxu0 %v2480_v6  ;;  %2202 = vmatprep.subr.bf16.mxu1 %v2696_v3  ;;  %v662_v6 = vrot.slane %v2951_v15, %v661_v61 }
  0x65   : > { %2194 = vmatprep.subr.bf16.mxu0 %v2696_v3 }
  0x66   : > { %2191 = vmatmul.mubr.msk.bf16.vlgmr.msra.gmra.mxu1 %vm549_vm2, %v527_v9 }
  0x67   : > { %2183 = vmatmul.mubr.msk.bf16.vlgmr.msra.gmra.mxu0 %vm549_vm2, %v527_v9  ;;  %2204 = vmatprep.mubr.msk.bf16.mxu1 %vm2697_vm1, %v2696_v3 }
  0x68   : > { %2198 = vmatprep.mubr.msk.bf16.mxu0 %vm2697_vm1, %v2696_v3  ;;  %2195 = vmatpush3.bf16.msra.mxu0 %v2481_v10 }
  0x69   : > { %2196 = vmatprep.subr.bf16.mxu0 %v2696_v3 }
  0x6c   : > { %2197 = vmatpush3.bf16.msra.mxu0 %v2482_v11 }
  0x6d   : > { %2208 = vmatprep.subr.bf16.mxu0 %v2696_v3 }
  0x6f   : > { %2199 = vmatmul.mubr.msk.bf16.vlgmr.msra.gmra.mxu0 %vm549_vm2, %v527_v9 }
  0x70   : > { %2210 = vmatprep.mubr.msk.bf16.mxu0 %vm2697_vm1, %v2696_v3 }
 0x126   : > { %v648_v18 = vpop.f32.mrf.mxu1 }
 0x127   : > { %v649_v19 = vadd.f32 %v648_v18, %v601_v16  ;;  %v587_v21 = vpop.f32.mrf.mxu0 }
 0x128   : > { %v2192_v22 = vpop.f32.mrf.mxu1  ;;  %v588_v26 = vadd.f32 %v587_v21, %v536_v20 }
 0x129   : > { %v2184_v23 = vpop.f32.mrf.mxu0  ;;  %v764_v24 = vpack.c.bf16 %v649_v19, %v649_v19 }
 0x12a   : > { %v651_v25 = vpop.f32.mrf.mxu1  ;;  %v736_v35 = vpack.c.bf16 %v588_v26, %v588_v26 }
 0x12b   : > { %v652_v27 = vadd.f32 %v651_v25, %v601_v16  ;;  %v590_v28 = vpop.f32.mrf.mxu0  ;;  %v806_v29 = vsel %vm801_vm3, %v764_v24, 0 }
 0x12c   : > { %v591_v30 = vadd.f32 %v590_v28, %v536_v20  ;;  %v2193_v31 = vpop.f32.mrf.mxu1  ;;  %2203 = vmatpush3.bf16.xpose.msra.mxu1 %v806_v29  ;;  %v800_v28 = vld [vmem:[%s3172_s1] sm:$0xff] }
 0x12d   : > { %v2185_v32 = vpop.f32.mrf.mxu0  ;;  %v2427_v33 = vpack.i.bf16 %v652_v27, %v649_v19  ;;  %v765_v34 = vpack.c.bf16 %v652_v27, %v652_v27  ;;  %2214 = vmatprep.subr.bf16.mxu1 %v2696_v3 }
 0x12e   : > { %v2432_v37 = vpack.i.bf16 %v591_v30, %v588_v26  ;;  %v737_v38 = vpack.c.bf16 %v591_v30, %v591_v30 }
 0x12f   : > { %2428 = vrot.lane.b32.xlu1 %v2427_v33, %s2698_s0  ;;  %2418 = vrot.lane.b32.xlu0 %v2427_v33, %s2699_s12  ;;  %v852_v36 = vsel %vm801_vm3, %v765_v34, 0  ;;  %v709_v39 = vpop.f32.mrf.mxu0 }
 0x130   : > { %2209 = vmatpush3.bf16.xpose.msra.mxu0 %v852_v36  ;;  %v2988_v14 = vadd.f32 %v709_v39, %v662_v6 }
 0x131   : > { %2220 = vmatprep.subr.bf16.mxu0 %v2696_v3  ;;  %v2200_v40 = vpop.f32.mrf.mxu0 }
 0x132   : > { %v792_v22 = vpack.c.bf16 %v2988_v14, %v2988_v14 }
 0x133   : > { %2205 = vmatmul.mubr.msk.bf16.vlgmr.msra.gmra.mxu1 %vm801_vm3, %v736_v35  ;;  %2433 = vrot.lane.b32.xlu1 %v2432_v37, %s2698_s0  ;;  %v712_v41 = vpop.f32.mrf.mxu0 }
 0x134   : > { %2423 = vrot.lane.b32.xlu0 %v2432_v37, %s2699_s12  ;;  %2216 = vmatprep.mubr.msk.bf16.mxu1 %vm2697_vm1, %v2696_v3  ;;  %v2990_v16 = vadd.f32 %v712_v41, %v662_v6  ;;  %v1271_v26 = vsel %vm1269_vm4, %v792_v22, 0 }
 0x135   : > { %v2201_v42 = vpop.f32.mrf.mxu0 }
 0x136   : > { %v793_v23 = vpack.c.bf16 %v2990_v16, %v2990_v16 }
 0x137   : > { %2443 = vrot.lane.b32.xlu1 %v2432_v37, %s2700_s13  ;;  %2211 = vmatmul.mubr.msk.bf16.vlgmr.msra.gmra.mxu0 %vm801_vm3, %v737_v38 }
 0x138   : > { %2438 = vrot.lane.b32.xlu0 %v2427_v33, %s2700_s13  ;;  %2222 = vmatprep.mubr.msk.bf16.mxu0 %vm2697_vm1, %v2696_v3  ;;  %v1317_v27 = vsel %vm1269_vm4, %v793_v23, 0  ;;  %v3032_v23 = vpack.i.bf16 %v2990_v16, %v2988_v14 }
 0x1a1   : > { %v2419_v43 = vpop.permute.xlu0 %2418  ;;  %v2429_v46 = vpop.permute.xlu1 %2428 }
 0x1a2   : > { %v2421_v44 = vunpack.i.h.bf16 %v2419_v43  ;;  %v2420_v45 = vunpack.i.l.bf16 %v2419_v43  ;;  %v2431_v49 = vunpack.i.h.bf16 %v2429_v46  ;;  %v2430_v50 = vunpack.i.l.bf16 %v2429_v46 }
 0x1a4   : > { %v767_v47 = vpack.c.bf16 %v2421_v44, %v2421_v44  ;;  %v766_v48 = vpack.c.bf16 %v2420_v45, %v2420_v45  ;;  %v769_v56 = vpack.c.bf16 %v2431_v49, %v2431_v49  ;;  %v768_v57 = vpack.c.bf16 %v2430_v50, %v2430_v50 }
 0x1a5   : > { %v2434_v62 = vpop.permute.xlu1 %2433 }
 0x1a6   : > { %v2424_v51 = vpop.permute.xlu0 %2423  ;;  %v898_v52 = vsel %vm801_vm3, %v766_v48, 0  ;;  %v944_v53 = vsel %vm801_vm3, %v767_v47, 0  ;;  %v990_v1 = vsel %vm801_vm3, %v768_v57, 0  ;;  %v1036_v2 = vsel %vm801_vm3, %v769_v56, 0 }
 0x1a7   : > { %2215 = vmatpush3.bf16.xpose.msra.mxu1 %v898_v52  ;;  %2221 = vmatpush3.bf16.xpose.msra.mxu0 %v944_v53  ;;  %v2426_v54 = vunpack.i.h.bf16 %v2424_v51  ;;  %v2425_v55 = vunpack.i.l.bf16 %v2424_v51  ;;  %v2436_v4 = vunpack.i.h.bf16 %v2434_v62  ;;  %v2435_v5 = vunpack.i.l.bf16 %v2434_v62 }
 0x1a8   : > { %2226 = vmatprep.subr.bf16.mxu1 %v2696_v3  ;;  %2232 = vmatprep.subr.bf16.mxu0 %v2696_v3 }
 0x1a9   : > { %v739_v59 = vpack.c.bf16 %v2426_v54, %v2426_v54  ;;  %v738_v60 = vpack.c.bf16 %v2425_v55, %v2425_v55  ;;  %v741_v11 = vpack.c.bf16 %v2436_v4, %v2436_v4  ;;  %v740_v12 = vpack.c.bf16 %v2435_v5, %v2435_v5  ;;  %v2444_v17 = vpop.permute.xlu1 %2443 }
 0x1aa   : > { %v2439_v58 = vpop.permute.xlu0 %2438  ;;  %v2446_v20 = vunpack.i.h.bf16 %v2444_v17  ;;  %v2445_v21 = vunpack.i.l.bf16 %v2444_v17 }
 0x1ab   : > { %v2441_v63 = vunpack.i.h.bf16 %v2439_v58  ;;  %v2440_v0 = vunpack.i.l.bf16 %v2439_v58 }
 0x1ac   : > { %v743_v24 = vpack.c.bf16 %v2446_v20, %v2446_v20  ;;  %v742_v25 = vpack.c.bf16 %v2445_v21, %v2445_v21 }
 0x1ad   : > { %v771_v9 = vpack.c.bf16 %v2441_v63, %v2441_v63  ;;  %v770_v10 = vpack.c.bf16 %v2440_v0, %v2440_v0 }
 0x1ae   : > { %2217 = vmatmul.mubr.msk.bf16.vlgmr.msra.gmra.mxu1 %vm801_vm3, %v738_v60  ;;  %2223 = vmatmul.mubr.msk.bf16.vlgmr.msra.gmra.mxu0 %vm801_vm3, %v739_v59 }
 0x1af   : > { %2227 = vmatpush3.bf16.xpose.msra.mxu1 %v990_v1  ;;  %2233 = vmatpush3.bf16.xpose.msra.mxu0 %v1036_v2  ;;  %v1082_v18 = vsel %vm801_vm3, %v770_v10, 0  ;;  %v1128_v19 = vsel %vm801_vm3, %v771_v9, 0 }
 0x1b0   : > { %2228 = vmatprep.mubr.msk.bf16.mxu1 %vm2697_vm1, %v2696_v3  ;;  %2234 = vmatprep.mubr.msk.bf16.mxu0 %vm2697_vm1, %v2696_v3 }
 0x1b1   : > { %2238 = vmatprep.subr.bf16.mxu1 %v2696_v3  ;;  %2244 = vmatprep.subr.bf16.mxu0 %v2696_v3 }
 0x1b6   : > { %2229 = vmatmul.mubr.msk.bf16.vlgmr.msra.gmra.mxu1 %vm801_vm3, %v740_v12  ;;  %2235 = vmatmul.mubr.msk.bf16.vlgmr.msra.gmra.mxu0 %vm801_vm3, %v741_v11 }
 0x1b7   : > { %2239 = vmatpush3.bf16.xpose.msra.mxu1 %v1082_v18  ;;  %2245 = vmatpush3.bf16.xpose.msra.mxu0 %v1128_v19 }
 0x1b8   : > { %2240 = vmatprep.mubr.msk.bf16.mxu1 %vm2697_vm1, %v2696_v3  ;;  %2246 = vmatprep.mubr.msk.bf16.mxu0 %vm2697_vm1, %v2696_v3 }
 0x1b9   : > { %2250 = vmatprep.subr.bf16.mxu1 %v2696_v3  ;;  %2256 = vmatprep.subr.bf16.mxu0 %v2696_v3 }
 0x1be   : > { %2241 = vmatmul.mubr.msk.bf16.vlgmr.msra.gmra.mxu1 %vm801_vm3, %v742_v25  ;;  %2247 = vmatmul.mubr.msk.bf16.vlgmr.msra.gmra.mxu0 %vm801_vm3, %v743_v24 }
 0x1bf   : > { %2251 = vmatpush3.bf16.msra.mxu1 %v1271_v26  ;;  %2257 = vmatpush3.bf16.msra.mxu0 %v1317_v27 }
 0x1c0   : > { %2258 = vmatprep.mubr.msk.bf16.mxu0 %vm2697_vm1, %v2696_v3  ;;  %2268 = vmatprep.subr.bf16.mxu0 %v2696_v3 }
 0x1c1   : > { %2252 = vmatprep.mubr.msk.bf16.mxu1 %vm2697_vm1, %v2696_v3  ;;  %2262 = vmatprep.subr.bf16.mxu1 %v2696_v3 }
 0x1f3   : > { %v842_v29 = vpop.f32.mrf.mxu1 }
 0x1f4   : > { %v3019_v30 = vadd.f32 %v842_v29, %v800_v28 }
 0x1f5   : > { %v2206_v31 = vpop.f32.mrf.mxu1 }
 0x1f6   : > { %v1170_v32 = vsel %vm801_vm3, %v3019_v30, -inf }
 0x1f7   : > { %v845_v33 = vpop.f32.mrf.mxu1  ;;  %1171 = vmax.xlane.f32.xlu0 %v1170_v32  ;;  %v888_v34 = vpop.f32.mrf.mxu0 }
 0x1f8   : > { %v889_v35 = vadd.f32 %v888_v34, %v800_v28 }
 0x1f9   : > { %v2207_v36 = vpop.f32.mrf.mxu1  ;;  %v2212_v37 = vpop.f32.mrf.mxu0 }
 0x1fa   : > { %v1173_v38 = vsel %vm801_vm3, %v889_v35, -inf }
 0x1fb   : > { %1174 = vmax.xlane.f32.xlu1 %v1173_v38  ;;  %v891_v39 = vpop.f32.mrf.mxu0 }
 0x1fd   : > { %v2213_v40 = vpop.f32.mrf.mxu0 }
 0x26e   : > { %v934_v41 = vpop.f32.mrf.mxu1  ;;  %v980_v42 = vpop.f32.mrf.mxu0 }
 0x26f   : > { %v935_v43 = vadd.f32 %v934_v41, %v800_v28  ;;  %v981_v46 = vadd.f32 %v980_v42, %v800_v28 }
 0x270   : > { %v2218_v44 = vpop.f32.mrf.mxu1  ;;  %v2224_v45 = vpop.f32.mrf.mxu0 }
 0x271   : > { %v1176_v47 = vsel %vm801_vm3, %v935_v43, -inf  ;;  %v1179_v52 = vsel %vm801_vm3, %v981_v46, -inf }
 0x272   : > { %1177 = vmax.xlane.f32.xlu0 %v1176_v47  ;;  %v937_v48 = vpop.f32.mrf.mxu1  ;;  %v983_v49 = vpop.f32.mrf.mxu0 }
 0x274   : > { %v2219_v50 = vpop.f32.mrf.mxu1  ;;  %v2225_v51 = vpop.f32.mrf.mxu0 }
 0x276   : > { %v1026_v53 = vpop.f32.mrf.mxu1  ;;  %1180 = vmax.xlane.f32.xlu0 %v1179_v52  ;;  %v1072_v54 = vpop.f32.mrf.mxu0 }
 0x277   : > { %v1027_v55 = vadd.f32 %v1026_v53, %v800_v28  ;;  %v1073_v56 = vadd.f32 %v1072_v54, %v800_v28 }
 0x278   : > { %v2230_v57 = vpop.f32.mrf.mxu1  ;;  %v2236_v58 = vpop.f32.mrf.mxu0 }
 0x279   : > { %v1182_v59 = vsel %vm801_vm3, %v1027_v55, -inf  ;;  %v1185_v60 = vsel %vm801_vm3, %v1073_v56, -inf }
 0x27a   : > { %v1029_v61 = vpop.f32.mrf.mxu1  ;;  %1183 = vmax.xlane.f32.xlu1 %v1182_v59  ;;  %1186 = vmax.xlane.f32.xlu0 %v1185_v60  ;;  %v1075_v62 = vpop.f32.mrf.mxu0 }
 0x27c   : > { %v2231_v63 = vpop.f32.mrf.mxu1  ;;  %v2237_v0 = vpop.f32.mrf.mxu0 }
 0x27e   : > { %v1118_v1 = vpop.f32.mrf.mxu1  ;;  %v1164_v2 = vpop.f32.mrf.mxu0 }
 0x27f   : > { %v1119_v4 = vadd.f32 %v1118_v1, %v800_v28  ;;  %v1165_v5 = vadd.f32 %v1164_v2, %v800_v28 }
 0x280   : > { %v2242_v6 = vpop.f32.mrf.mxu1  ;;  %v2248_v9 = vpop.f32.mrf.mxu0 }
 0x281   : > { %v1188_v10 = vsel %vm801_vm3, %v1119_v4, -inf  ;;  %v1191_v11 = vsel %vm801_vm3, %v1165_v5, -inf  ;;  %v1172_v26 = vpop.xlane.xlu0 %1171 }
 0x282   : > { %v1121_v12 = vpop.f32.mrf.mxu1  ;;  %1189 = vmax.xlane.f32.xlu1 %v1188_v10  ;;  %1192 = vmax.xlane.f32.xlu0 %v1191_v11  ;;  %v1167_v17 = vpop.f32.mrf.mxu0  ;;  %v1194_v27 = vsub.f32 %v3019_v30, %v1172_v26 }
 0x284   : > { %v2243_v18 = vpop.f32.mrf.mxu1  ;;  %v1175_v19 = vpop.xlane.xlu1 %1174  ;;  %v1202_v28 = vmul.f32 1.442695, %v1194_v27 }
 0x285   : > { %v1195_v20 = vsub.f32 %v889_v35, %v1175_v19  ;;  %v2249_v21 = vpop.f32.mrf.mxu0 }
 0x287   : > { %v1204_v22 = vmul.f32 1.442695, %v1195_v20 }
 0x289   : > { %2491 = vpow2.f32 %v1204_v22 }
 0x28a   : > { %2493 = vpow2.f32 %v1202_v28 }
 0x293   : > { %2448 = vrot.lane.b32.xlu1 %v3032_v23, %s2699_s12 }
 0x296   : > { %v2492_v24 = vpop.eup %2491 }
 0x297   : > { %v1221_v25 = vsel %vm801_vm3, %v2492_v24, 0.0  ;;  %v3038_v29 = vpop.eup %2493 }
 0x298   : > { %1222 = vadd.xlane.f32.xlu0 %v1221_v25  ;;  %v1218_v31 = vsel %vm801_vm3, %v3038_v29, 0.0 }
 0x2b7   : > { %1219 = vadd.xlane.f32.xlu1 %v1218_v31 }
 0x2fb   : > { %v1178_v14 = vpop.xlane.xlu0 %1177 }
 0x2fc   : > { %v1196_v16 = vsub.f32 %v935_v43, %v1178_v14 }
 0x2fe   : > { %v1206_v32 = vmul.f32 1.442695, %v1196_v16 }
 0x2ff   : > { %v1181_v33 = vpop.xlane.xlu0 %1180 }
 0x300   : > { %2495 = vpow2.f32 %v1206_v32  ;;  %v1197_v34 = vsub.f32 %v981_v46, %v1181_v33 }
 0x302   : > { %v1208_v35 = vmul.f32 1.442695, %v1197_v34 }
 0x303   : > { %v1184_v36 = vpop.xlane.xlu1 %1183  ;;  %v1187_v37 = vpop.xlane.xlu0 %1186 }
 0x304   : > { %2497 = vpow2.f32 %v1208_v35  ;;  %v1198_v38 = vsub.f32 %v1027_v55, %v1184_v36  ;;  %v1199_v30 = vsub.f32 %v1073_v56, %v1187_v37 }
 0x306   : > { %v1210_v39 = vmul.f32 1.442695, %v1198_v38  ;;  %v1212_v40 = vmul.f32 1.442695, %v1199_v30 }
 0x308   : > { %2499 = vpow2.f32 %v1210_v39 }
 0x309   : > { %2501 = vpow2.f32 %v1212_v40 }
 0x30b   : > { %v1190_v41 = vpop.xlane.xlu1 %1189  ;;  %v1193_v42 = vpop.xlane.xlu0 %1192 }
 0x30c   : > { %v1200_v44 = vsub.f32 %v1119_v4, %v1190_v41  ;;  %v1201_v45 = vsub.f32 %v1165_v5, %v1193_v42 }
 0x30d   : > { %v2496_v47 = vpop.eup %2495 }
 0x30e   : > { %v1214_v43 = vmul.f32 1.442695, %v1200_v44  ;;  %v1216_v48 = vmul.f32 1.442695, %v1201_v45  ;;  %v1224_v49 = vsel %vm801_vm3, %v2496_v47, 0.0 }
 0x30f   : > { %1225 = vadd.xlane.f32.xlu1 %v1224_v49  ;;  %v2449_v60 = vpop.permute.xlu1 %2448 }
 0x310   : > { %2503 = vpow2.f32 %v1214_v43  ;;  %v2451_v61 = vunpack.i.h.bf16 %v2449_v60  ;;  %v2450_v5 = vunpack.i.l.bf16 %v2449_v60 }
 0x311   : > { %v2498_v46 = vpop.eup %2497  ;;  %2505 = vpow2.f32 %v1216_v48 }
 0x312   : > { %v1227_v50 = vsel %vm801_vm3, %v2498_v46, 0.0  ;;  %v795_v63 = vpack.c.bf16 %v2451_v61, %v2451_v61  ;;  %v794_v9 = vpack.c.bf16 %v2450_v5, %v2450_v5 }
 0x313   : > { %1228 = vadd.xlane.f32.xlu0 %v1227_v50 }
 0x314   : > { %v1409_v2 = vsel %vm1269_vm4, %v795_v63, 0  ;;  %v1363_v12 = vsel %vm1269_vm4, %v794_v9, 0 }
 0x315   : > { %v3044_v51 = vpop.eup %2499 }
 0x316   : > { %v3046_v52 = vpop.eup %2501  ;;  %v1230_v53 = vsel %vm801_vm3, %v3044_v51, 0.0 }
 0x317   : > { %1231 = vadd.xlane.f32.xlu1 %v1230_v53  ;;  %v1233_v54 = vsel %vm801_vm3, %v3046_v52, 0.0 }
 0x318   : > { %1234 = vadd.xlane.f32.xlu0 %v1233_v54 }
 0x31d   : > { %v3052_v55 = vpop.eup %2503 }
 0x31e   : > { %v3054_v56 = vpop.eup %2505  ;;  %v1236_v57 = vsel %vm801_vm3, %v3052_v55, 0.0 }
 0x31f   : > { %1237 = vadd.xlane.f32.xlu1 %v1236_v57  ;;  %v1239_v58 = vsel %vm801_vm3, %v3054_v56, 0.0 }
 0x320   : > { %1240 = vadd.xlane.f32.xlu0 %v1239_v58 }
 0x321   : > { %v1223_v59 = vpop.xlane.xlu0 %1222 }
 0x322   : > { %2507 = vrcp.f32 %v1223_v59 }
 0x32f   : > { %v2508_v62 = vpop.eup %2507 }
 0x330   : > { %2458 = vrot.lane.b32.xlu1 %v3032_v23, %s2700_s13  ;;  %v1251_v0 = vmul.f32 %v2508_v62, %v2492_v24 }
 0x332   : > { %v1259_v1 = vpack.c.bf16 %v1251_v0, %v1251_v0 }
 0x334   : > { %2259 = vmatmul.mubr.msk.bf16.vlgmr.msra.gmra.mxu0 %vm801_vm3, %v1259_v1  ;;  %v2483_v1 = vld [vmem:[%s3200_s28 + $0x8] sm:$0xff]  }
 0x335   : > { %2269 = vmatpush3.bf16.msra.mxu0 %v1409_v2  ;;  %2270 = vmatprep.mubr.msk.bf16.mxu0 %vm2697_vm1, %v2696_v3 }
 0x336   : > { %2453 = vrot.lane.b32.xlu0 %v3032_v23, %s2698_s0  ;;  %2280 = vmatprep.subr.bf16.mxu0 %v2696_v3 }
 0x340   : > { %v1220_v4 = vpop.xlane.xlu1 %1219 }
 0x341   : > { %2509 = vrcp.f32 %v1220_v4 }
 0x34e   : > { %v2510_v6 = vpop.eup %2509 }
 0x34f   : > { %v1250_v10 = vmul.f32 %v2510_v6, %v3038_v29 }
 0x351   : > { %v1258_v11 = vpack.c.bf16 %v1250_v10, %v1250_v10 }
 0x353   : > { %2253 = vmatmul.mubr.msk.bf16.vlgmr.msra.gmra.mxu1 %vm801_vm3, %v1258_v11  ;;  %v2484_v11 = vld [vmem:[%s3201_s30] sm:$0xff]  }
 0x354   : > { %2263 = vmatpush3.bf16.msra.mxu1 %v1363_v12  ;;  %2264 = vmatprep.mubr.msk.bf16.mxu1 %vm2697_vm1, %v2696_v3 }
 0x355   : > { %2274 = vmatprep.subr.bf16.mxu1 %v2696_v3 }
 0x398   : > { %v1226_v17 = vpop.xlane.xlu1 %1225 }
 0x399   : > { %2511 = vrcp.f32 %v1226_v17 }
 0x39c   : > { %v1229_v18 = vpop.xlane.xlu0 %1228 }
 0x39d   : > { %2513 = vrcp.f32 %v1229_v18 }
 0x3a0   : > { %v1232_v19 = vpop.xlane.xlu1 %1231 }
 0x3a1   : > { %2515 = vrcp.f32 %v1232_v19  ;;  %v1235_v20 = vpop.xlane.xlu0 %1234 }
 0x3a2   : > { %2517 = vrcp.f32 %v1235_v20 }
 0x3a6   : > { %v2512_v21 = vpop.eup %2511 }
 0x3a7   : > { %v1252_v22 = vmul.f32 %v2512_v21, %v2496_v47 }
 0x3a8   : > { %v1238_v23 = vpop.xlane.xlu1 %1237 }
 0x3a9   : > { %2519 = vrcp.f32 %v1238_v23  ;;  %v1241_v24 = vpop.xlane.xlu0 %1240  ;;  %v1260_v25 = vpack.c.bf16 %v1252_v22, %v1252_v22 }
 0x3aa   : > { %v2514_v26 = vpop.eup %2513  ;;  %2521 = vrcp.f32 %v1241_v24 }
 0x3ab   : > { %2265 = vmatmul.mubr.msk.bf16.vlgmr.msra.gmra.mxu1 %vm801_vm3, %v1260_v25  ;;  %v1253_v27 = vmul.f32 %v2514_v26, %v2498_v46 }
 0x3ac   : > { %v2459_v28 = vpop.permute.xlu1 %2458  ;;  %2276 = vmatprep.mubr.msk.bf16.mxu1 %vm2697_vm1, %v2696_v3 }
 0x3ad   : > { %v2454_v29 = vpop.permute.xlu0 %2453  ;;  %v1261_v31 = vpack.c.bf16 %v1253_v27, %v1253_v27  ;;  %v2460_v16 = vunpack.i.l.bf16 %v2459_v28  ;;  %v2461_v35 = vunpack.i.h.bf16 %v2459_v28 }
 0x3ae   : > { %v2516_v14 = vpop.eup %2515  ;;  %v2456_v32 = vunpack.i.h.bf16 %v2454_v29  ;;  %v2455_v33 = vunpack.i.l.bf16 %v2454_v29 }
 0x3af   : > { %v2518_v34 = vpop.eup %2517  ;;  %2271 = vmatmul.mubr.msk.bf16.vlgmr.msra.gmra.mxu0 %vm801_vm3, %v1261_v31  ;;  %v1254_v38 = vmul.f32 %v2516_v14, %v3044_v51  ;;  %v798_v39 = vpack.c.bf16 %v2460_v16, %v2460_v16  ;;  %v799_v42 = vpack.c.bf16 %v2461_v35, %v2461_v35 }
 0x3b0   : > { %v797_v36 = vpack.c.bf16 %v2456_v32, %v2456_v32  ;;  %v796_v37 = vpack.c.bf16 %v2455_v33, %v2455_v33  ;;  %2282 = vmatprep.mubr.msk.bf16.mxu0 %vm2697_vm1, %v2696_v3  ;;  %v1255_v30 = vmul.f32 %v2518_v34, %v3046_v52 }
 0x3b1   : > { %v1262_v44 = vpack.c.bf16 %v1254_v38, %v1254_v38  ;;  %v1547_v43 = vsel %vm1269_vm4, %v798_v39, 0  ;;  %v1593_v49 = vsel %vm1269_vm4, %v799_v42, 0 }
 0x3b2   : > { %v1455_v40 = vsel %vm1269_vm4, %v796_v37, 0  ;;  %v1501_v41 = vsel %vm1269_vm4, %v797_v36, 0  ;;  %v1263_v45 = vpack.c.bf16 %v1255_v30, %v1255_v30 }
 0x3b3   : > { %2275 = vmatpush3.bf16.msra.mxu1 %v1455_v40  ;;  %2281 = vmatpush3.bf16.msra.mxu0 %v1501_v41 }
 0x3b4   : > { %2286 = vmatprep.subr.bf16.mxu1 %v2696_v3  ;;  %2292 = vmatprep.subr.bf16.mxu0 %v2696_v3 }
 0x3b6   : > { %v2520_v47 = vpop.eup %2519  ;;  %2277 = vmatmul.mubr.msk.bf16.vlgmr.msra.gmra.mxu1 %vm801_vm3, %v1262_v44 }
 0x3b7   : > { %v2522_v48 = vpop.eup %2521  ;;  %2287 = vmatpush3.bf16.msra.mxu1 %v1547_v43  ;;  %2283 = vmatmul.mubr.msk.bf16.vlgmr.msra.gmra.mxu0 %vm801_vm3, %v1263_v45  ;;  %v1256_v46 = vmul.f32 %v2520_v47, %v3052_v55 }
 0x3b8   : > { %2293 = vmatpush3.bf16.msra.mxu0 %v1593_v49  ;;  %2288 = vmatprep.mubr.msk.bf16.mxu1 %vm2697_vm1, %v2696_v3  ;;  %v1257_v50 = vmul.f32 %v2522_v48, %v3054_v56  ;;  %v2485_v48 = vld [vmem:[%s430_s26 + $0x8] sm:$0xff]   ;;  %v2486_v49 = vld [vmem:[%s430_s26] sm:$0xff]  }
 0x3b9   : > { %2294 = vmatprep.mubr.msk.bf16.mxu0 %vm2697_vm1, %v2696_v3  ;;  %2298 = vmatprep.subr.bf16.mxu1 %v2696_v3  ;;  %v1264_v51 = vpack.c.bf16 %v1256_v46, %v1256_v46  ;;  %v2487_v46 = vld [vmem:[%s2909_s6 + $0x18] sm:$0xff]  }
 0x3ba   : > { %2306 = vmatprep.subr.bf16.mxu0 %v2696_v3  ;;  %v1265_v52 = vpack.c.bf16 %v1257_v50, %v1257_v50  ;;  %v1674_v50 = vsub.s32 3, %v2947_v13 }
 0x3be   : > { %2289 = vmatmul.mubr.msk.bf16.vlgmr.msra.gmra.mxu1 %vm801_vm3, %v1264_v51  ;;  %v1675_v51 = vrot.slane %v2951_v15, %v1674_v50 }
 0x3bf   : > { %2295 = vmatmul.mubr.msk.bf16.vlgmr.msra.gmra.mxu0 %vm801_vm3, %v1265_v52  ;;  %2302 = vmatprep.mubr.msk.bf16.mxu1 %vm2697_vm1, %v2696_v3 }
 0x3c0   : > { %2310 = vmatprep.mubr.msk.bf16.mxu0 %vm2697_vm1, %v2696_v3  ;;  %2299 = vmatpush3.bf16.msra.mxu1 %v2483_v1 }
 0x3c1   : > { %2300 = vmatprep.subr.bf16.mxu1 %v2696_v3  ;;  %2307 = vmatpush3.bf16.msra.mxu0 %v2485_v48 }
 0x3c2   : > { %2308 = vmatprep.subr.bf16.mxu0 %v2696_v3 }
 0x3c4   : > { %2301 = vmatpush3.bf16.msra.mxu1 %v2484_v11 }
 0x3c5   : > { %2314 = vmatprep.subr.bf16.mxu1 %v2696_v3  ;;  %2309 = vmatpush3.bf16.msra.mxu0 %v2486_v49 }
 0x3f4   : > { %v1353_v53 = vpop.f32.mrf.mxu0 }
 0x3f6   : > { %v2260_v54 = vpop.f32.mrf.mxu0 }
 0x3f8   : > { %v1356_v55 = vpop.f32.mrf.mxu0 }
 0x3fa   : > { %v2261_v56 = vpop.f32.mrf.mxu0 }
 0x413   : > { %v1307_v57 = vpop.f32.mrf.mxu1 }
 0x415   : > { %v2254_v58 = vpop.f32.mrf.mxu1 }
 0x417   : > { %v1310_v59 = vpop.f32.mrf.mxu1 }
 0x419   : > { %v2255_v60 = vpop.f32.mrf.mxu1 }
 0x46b   : > { %v1399_v61 = vpop.f32.mrf.mxu1 }
 0x46d   : > { %v2266_v62 = vpop.f32.mrf.mxu1 }
 0x46e   : > { %v2489_v62 = vld [vmem:[%s2909_s6 + $0x8] sm:$0xff]  }
 0x46f   : > { %v1402_v63 = vpop.f32.mrf.mxu1  ;;  %v1445_v0 = vpop.f32.mrf.mxu0 }
 0x470   : > { %v2462_v2 = vpack.i.bf16 %v1445_v0, %v1399_v61  ;;  %v2488_v61 = vld [vmem:[%s2909_s6 + $0x10] sm:$0xff]   ;;  %v2490_v63 = vld [vmem:[%s2909_s6] sm:$0xff]   ;;  %v1741_v0 = vsub.s32 4, %v2947_v13  ;;  %s2704_s6 = smov [#allocation8]  }
 0x471   : > { %v2267_v4 = vpop.f32.mrf.mxu1  ;;  %v2272_v5 = vpop.f32.mrf.mxu0  ;;  %s1898_s16 = sshll.u32 %s2704_s6, 4  ;;  %s1899_s16 = int_to_ptr.vmem [resolvable:$true] %s1898_s16 }
 0x472   : > { %2463 = vrot.lane.b32.xlu1 %v2462_v2, %s2701_s23  ;;  %v1742_v1 = vrot.slane %v2951_v15, %v1741_v0  ;;  %s2605_s20 = scalar_lea.vmem %s1899_s16, 256  ;;  %p2612_p7 = scmp.lt.s32.totalorder %s1899_s16, %s1899_s16 }
 0x473   : > { %v1448_v6 = vpop.f32.mrf.mxu0  ;;  %p2606_p8 = scmp.ne.s32.totalorder %s1899_s16, %s2605_s20  ;;  %p2613_p9 = scmp.lt.s32.totalorder %s2605_s20, %s2605_s20 }
 0x475   : > { %v2273_v9 = vpop.f32.mrf.mxu0  ;;  %p2607_p10 = pnand %p2606_p8, %p2352_p5  ;;  %p2614_p11 = por %p2613_p9, %p2612_p7 }
 0x476   : > { %v1491_v10 = vpop.f32.mrf.mxu1 }
 0x477   : > { %v1537_v12 = vpop.f32.mrf.mxu0  ;;  %p2608_p4 = pneg %p2607_p10 }
 0x478   : > { %v2278_v17 = vpop.f32.mrf.mxu1  ;;  %v2467_v18 = vpack.i.bf16 %v1537_v12, %v1491_v10 }
 0x479   : > { %v2284_v19 = vpop.f32.mrf.mxu0  ;;  %p2615_p12 = pnand %p2614_p11, %p2608_p4 }
 0x47a   : > { %v1494_v20 = vpop.f32.mrf.mxu1  ;;  %2468 = vrot.lane.b32.xlu0 %v2467_v18, %s2702_s27 }
 0x47b   : > { %v1540_v21 = vpop.f32.mrf.mxu0 }
 0x47c   : > { %v2279_v22 = vpop.f32.mrf.mxu1 }
 0x47d   : > { %v2285_v23 = vpop.f32.mrf.mxu0 }
 0x47e   : > { %v1583_v24 = vpop.f32.mrf.mxu1 }
 0x47f   : > { %v1629_v25 = vpop.f32.mrf.mxu0 }
 0x480   : > { %v2290_v26 = vpop.f32.mrf.mxu1  ;;  %v2472_v27 = vpack.i.bf16 %v1629_v25, %v1583_v24 }
 0x481   : > { %v2296_v28 = vpop.f32.mrf.mxu0 }
 0x482   : > { %v1586_v29 = vpop.f32.mrf.mxu1  ;;  %2473 = vrot.lane.b32.xlu1 %v2472_v27, %s2703_s18 }
 0x483   : > { %v1632_v31 = vpop.f32.mrf.mxu0 }
 0x484   : > { %v2291_v14 = vpop.f32.mrf.mxu1 }
 0x485   : > { %v2297_v16 = vpop.f32.mrf.mxu0 }
 0x4e4   : > { %v2464_v32 = vpop.permute.xlu1 %2463 }
 0x4e5   : > { %v2466_v34 = vunpack.i.h.bf16 %v2464_v32  ;;  %v2465_v35 = vunpack.i.l.bf16 %v2464_v32 }
 0x4e7   : > { %v1660_v30 = vsel %vm801_vm3, %v1353_v53, %v2466_v34  ;;  %v1659_v39 = vsel %vm801_vm3, %v1307_v57, %v2465_v35 }
 0x4ec   : > { %v2469_v33 = vpop.permute.xlu0 %2468 }
 0x4ed   : > { %v2471_v36 = vunpack.i.h.bf16 %v2469_v33  ;;  %v2470_v37 = vunpack.i.l.bf16 %v2469_v33 }
 0x4ef   : > { %v1663_v42 = vsel %vm1661_vm5, %v1660_v30, %v2471_v36  ;;  %v1662_v44 = vsel %vm1661_vm5, %v1659_v39, %v2470_v37 }
 0x4f4   : > { %v2474_v38 = vpop.permute.xlu1 %2473 }
 0x4f5   : > { %v2476_v40 = vunpack.i.h.bf16 %v2474_v38  ;;  %v2475_v41 = vunpack.i.l.bf16 %v2474_v38 }
 0x4f7   : > { %v1666_v45 = vsel %vm1664_vm6, %v1663_v42, %v2476_v40  ;;  %v1665_v47 = vsel %vm1664_vm6, %v1662_v44, %v2475_v41 }
 0x4f8   : > { %v1667_v43 = vpack.c.bf16 %v1666_v45, %v1665_v47 }
 0x4fa   : > { %2303 = vmatmul.mubr.msk.bf16.vlgmr.msra.gmra.mxu1 %vm549_vm2, %v1667_v43 }
 0x4fb   : > { %2322 = vmatprep.mubr.msk.bf16.mxu1 %vm2697_vm1, %v2696_v3  ;;  %2315 = vmatpush3.bf16.msra.mxu1 %v2487_v46 }
 0x4fc   : > { %2316 = vmatprep.subr.bf16.mxu1 %v2696_v3 }
 0x4ff   : > { %2317 = vmatpush3.bf16.msra.mxu1 %v2488_v61 }
 0x500   : > { %2318 = vmatprep.subr.bf16.mxu1 %v2696_v3 }
 0x503   : > { %2319 = vmatpush3.bf16.msra.mxu1 %v2489_v62 }
 0x504   : > { %2320 = vmatprep.subr.bf16.mxu1 %v2696_v3  ;;  %v1883_v3 = vsub.s32 5, %v2947_v13 }
 0x506   : > { %v1884_v12 = vrot.slane %v2951_v15, %v1883_v3 }
 0x507   : > { %2321 = vmatpush3.bf16.msra.mxu1 %v2490_v63 }
 0x5ba   : > { %v1725_v52 = vpop.f32.mrf.mxu1 }
 0x5bb   : > { %v1726_v54 = vadd.f32 %v1725_v52, %v1675_v51 }
 0x5bc   : > { %v2304_v53 = vpop.f32.mrf.mxu1 }
 0x5bd   : > { %v1732_v58 = vadd.f32 %v1726_v54, %v2924_v7 }
 0x5be   : > { %v1728_v55 = vpop.f32.mrf.mxu1 }
 0x5bf   : > { %v1729_v56 = vadd.f32 %v1728_v55, %v1675_v51 }
 0x5c0   : > { %v2305_v57 = vpop.f32.mrf.mxu1 }
 0x5c1   : > { %v1733_v59 = vadd.f32 %v1729_v56, %v2926_v8 }
 0x5c3   : > { %v1734_v60 = vpack.c.bf16 %v1733_v59, %v1732_v58 }
 0x5c5   : > { %2311 = vmatmul.mubr.msk.bf16.vlgmr.msra.gmra.mxu0 %vm549_vm2, %v1734_v60 }
 0x685   : > { %v1792_v7 = vpop.f32.mrf.mxu0 }
 0x686   : > { %v1793_v8 = vadd.f32 %v1792_v7, %v1742_v1 }
 0x687   : > { %v2312_v2 = vpop.f32.mrf.mxu0 }
 0x688   : > { %v1799_v9 = vmax.f32 %v1793_v8, 0.0 }
 0x689   : > { %v1795_v4 = vpop.f32.mrf.mxu0 }
 0x68a   : > { %v1796_v5 = vadd.f32 %v1795_v4, %v1742_v1 }
 0x68b   : > { %v2313_v6 = vpop.f32.mrf.mxu0 }
 0x68c   : > { %v1800_v10 = vmax.f32 %v1796_v5, 0.0 }
 0x68e   : > { %v1801_v11 = vpack.c.bf16 %v1800_v10, %v1799_v9 }
 0x690   : > { %2323 = vmatmul.mubr.msk.bf16.vlgmr.msra.gmra.mxu1 %vm1834_vm7, %v1801_v11 }
 0x750   : > { %v1872_v17 = vpop.f32.mrf.mxu1 }
 0x751   : > { %v1879_v18 = vadd.f32 %v1872_v17, %v1732_v58 }
 0x752   : > { %v2324_v19 = vpop.f32.mrf.mxu1 }
 0x753   : > { %v1885_v20 = vadd.f32 %v1884_v12, %v1879_v18 }
 0x754   : > { %v1875_v21 = vpop.f32.mrf.mxu1 }
 0x755   : > { %1887 = vst.msk [vmem:[#allocation8] sm:$0xff] %vm549_vm2, %v1885_v20  ;;  %v1880_v22 = vadd.f32 %v1875_v21, %v1733_v59 }
 0x756   : > { %v2325_v23 = vpop.f32.mrf.mxu1 }
 0x757   : > { %v1886_v24 = vadd.f32 %v1884_v12, %v1880_v22 }
 0x759   : > { %1888 = vst.msk [vmem:[#allocation8 + $0x8] sm:$0xff] %vm549_vm2, %v1886_v24 }
 0x75a   : > { %2618 = shalt.err (!%p2615_p12)
}
 0x75b   : > { %s2705_s25 = smov 128  }
 0x75c   : > { %2335 = dma.vmem_to_hbm [thread:$0]  (%p2352_p5), %s1899_s16, 256, %s3180_s9, [#allocation4], %s2705_s25, %s2705_s25, %s2701_s23  }
 0x75d   : > { %2662 = dma.done.wait (%p2352_p5), [#allocation4], 256  }
 0x75e   : > { %2664 = vsyncadd (%p2352_p5), [#allocation4], 4294967040 }
 0x75f PF: > { %s24_s14 = sadd.s32 1, %s2687_s14   ;;  %s3202_s19 = sld [smem:[#allocation14_spill]] }
 0x760   : > { %p21_p13 = scmp.ge.s32.totalorder %s24_s14, 4   ;;  %s3203_s12 = sld [smem:[#allocation12_spill]] }
 0x761   : > { %s3204_s13 = sld [smem:[#allocation13_spill]]  ;;  %s3205_s30 = smov %s2671_s10 }
 0x762   : > { %s3206_s10 = smov %s2675_s11  ;;  %23 = sbr.rel (!%p21_p13) target bundleno = 10 (0xa), region = 130 }
 0x765   : > { %s3207_s11 = smov %s3202_s19 }
 0x767   :  { %1914 = vsyncpa [#allocation3], 1 }
 0x768   :  { %1916 = vsyncpa [#allocation3 + $0x1], 1 }
 0x769   :  { %1917 = vsyncpa [#allocation6], 1 }
 0x76a   :  { %1919 = vsyncpa [#allocation6 + $0x1], 1 }
 0x76b   :  { %1920 = vsyncpa [#allocation4], 1 }
 0x76c   :  { %1922 = vsyncpa [#allocation4 + $0x1], 1 }

</bundles_post_ra>
